<compile_context>
chip_gen: v7x
topology: tpu7x:2x2x1
jax: 0.10.0
libtpu: 0.0.40
codegen_flags: <defaults>
</compile_context>

<pallas_src>
import functools

import jax
import jax.numpy as jnp
from jax.experimental import pallas as pl
from jax.experimental.pallas import tpu as pltpu


def _gnn_kernel(adj_ref, xw1_ref, onehot_ref,
                b1_ref, w2_ref, b2_ref, w3_ref, b3_ref, w4_ref, b4_ref,
                out_ref, z1w2_scr, pooled_scr,
                *, adj_resident, adj_needs_cast, tile_m):
    f32 = jnp.float32
    bf16 = jnp.bfloat16

    phase = pl.program_id(0)          # 0: layer 1, 1: layer 2 + pool + head
    tile = pl.program_id(1)           # row-tile index
    n_tiles = pl.num_programs(1)
    row0 = pl.multiple_of(tile * tile_m, tile_m)

    if adj_resident:
        # whole adjacency lives in VMEM (DMA'd once); slice the current rows.
        adj_bf = adj_ref[pl.ds(row0, tile_m), :]            # (TM, N) bf16
    else:
        adj_bf = adj_ref[...]                               # (TM, N) streamed
        if adj_needs_cast:                                   # int8 {0,1} storage
            adj_bf = adj_bf.astype(f32).astype(bf16)

    # ---- phase 0: z1 = relu(adj@(XW1) + (XW1)[rows] + b1); store (z1@W2) ----
    @pl.when(phase == 0)
    def _layer1():
        ax = jnp.dot(adj_bf, xw1_ref[...], preferred_element_type=f32)
        ax = ax + xw1_ref[pl.ds(row0, tile_m), :].astype(f32) + b1_ref[...]
        z1 = jnp.maximum(ax, 0.0)
        z1w2 = jnp.dot(z1, w2_ref[...], preferred_element_type=f32)
        z1w2_scr[pl.ds(row0, tile_m), :] = z1w2.astype(bf16)

    # ---- phase 1: x2 = adj@(Z1W2) + (Z1W2)[rows] + b2; pooled += onehot^T@x2 -
    @pl.when(phase == 1)
    def _layer2_pool_head():
        @pl.when(tile == 0)
        def _init():
            pooled_scr[...] = jnp.zeros_like(pooled_scr)

        az = jnp.dot(adj_bf, z1w2_scr[...], preferred_element_type=f32)
        x2 = az + z1w2_scr[pl.ds(row0, tile_m), :].astype(f32) + b2_ref[...]

        # sum-pool readout (scatter_add over graph ids) as an f32 one-hot matmul
        pooled_scr[...] += jax.lax.dot_general(
            onehot_ref[...], x2,
            dimension_numbers=(((0,), (0,)), ((), ())),       # onehot^T @ x2
            preferred_element_type=f32)

        # graph-level MLP head + log_softmax once every row tile is pooled
        @pl.when(tile == n_tiles - 1)
        def _head():
            zg = jnp.dot(pooled_scr[...], w3_ref[...],
                         preferred_element_type=f32) + b3_ref[...]
            zg = jnp.maximum(zg, 0.0)
            logits = jnp.dot(zg, w4_ref[...],
                             preferred_element_type=f32) + b4_ref[...]
            m = jnp.max(logits, axis=1, keepdims=True)
            shifted = logits - m
            lse = jnp.log(jnp.sum(jnp.exp(shifted), axis=1, keepdims=True))
            out_ref[...] = (shifted - lse).astype(out_ref.dtype)


def gnn_forward(x_in, adj, idx, params, num_graphs, *, tile_m=256,
                adj_resident=None, vmem_limit_bytes=None):
    """GNN forward pass.

    tile_m: adjacency row-tile height (clamped to N).  Must be a multiple of 16
    (32 when the adjacency streams as int8).  For very large N keep
    2 * tile_m * N bytes of double-buffered adjacency inside the VMEM limit.
    """
    (w1, b1), (w2, b2), (w3, b3), (w4, b4) = params
    n, _ = x_in.shape
    h1, h2 = w1.shape[1], w2.shape[1]
    n_class = w4.shape[1]
    tile_m = min(tile_m, n)

    # Per-generation VMEM budget: ~48 MiB on v7x (64 MiB/TC), ~96-100 MiB on
    # v5e/v6e (128 MiB/TC).
    if vmem_limit_bytes is None:
        try:
            cap = getattr(pltpu.get_tpu_info(), "vmem_capacity_bytes", None)
        except Exception:
            cap = None
        if not cap:
            cap = 64 * 1024 * 1024
        vmem_limit_bytes = int(min(100 * 1024 * 1024, (cap * 3) // 4))

    if adj_resident is None:
        # resident (bf16, conservatively counted double-buffered) if it fits
        # inside ~1/3 of the budget -> adjacency read from HBM once, not twice.
        adj_resident = 4 * n * n <= vmem_limit_bytes // 3

    if adj_resident:
        adj_arg = adj.astype(jnp.bfloat16)          # exact for 0/1 adjacency
        align = 16
    else:
        is_binary = bool(jnp.all((adj == 0) | (adj == 1)))
        if is_binary:
            adj_arg = adj.astype(jnp.int8)          # halve the dominant stream
            align = 32
        else:
            adj_arg = adj.astype(jnp.bfloat16)
            align = 16
    assert n % tile_m == 0, "N must be a multiple of tile_m"
    assert tile_m % align == 0, f"tile_m must be a multiple of {align}"
    n_tiles = n // tile_m

    # Reassociated layer-1 matmul: (adj+I)@X@W1 == adj@(X@W1) + X@W1.
    xw1_bf = (x_in @ w1).astype(jnp.bfloat16)                       # (N, H1)
    onehot = (idx.astype(jnp.int32)[:, None] ==
              jnp.arange(num_graphs, dtype=jnp.int32)[None, :]).astype(jnp.float32)

    row_map = lambda p, i: (i, 0)
    const_map = lambda p, i: (0, 0)
    full = lambda a: pl.BlockSpec(a.shape, const_map)

    adj_spec = (pl.BlockSpec((n, n), const_map) if adj_resident
                else pl.BlockSpec((tile_m, n), row_map))

    grid_spec = pltpu.PrefetchScalarGridSpec(
        num_scalar_prefetch=0,
        grid=(2, n_tiles),                            # (phase, row tile)
        in_specs=[
            adj_spec,
            full(xw1_bf),                             # X@W1, bf16, DMA'd once
            pl.BlockSpec((tile_m, num_graphs), row_map),   # one-hot row tile
            full(b1), full(w2), full(b2),
            full(w3), full(b3), full(w4), full(b4),
        ],
        out_specs=pl.BlockSpec((num_graphs, n_class), const_map),
        scratch_shapes=[
            pltpu.VMEM((n, h2), jnp.bfloat16),            # Z1@W2 (persists)
            pltpu.VMEM((num_graphs, h2), jnp.float32),    # pooled accumulator
        ],
    )

    kernel = functools.partial(
        _gnn_kernel,
        adj_resident=adj_resident,
        adj_needs_cast=(adj_arg.dtype != jnp.bfloat16),
        tile_m=tile_m,
    )
    return pl.pallas_call(
        kernel,
        out_shape=jax.ShapeDtypeStruct((num_graphs, n_class), jnp.float32),
        grid_spec=grid_spec,
        compiler_params=pltpu.CompilerParams(
            dimension_semantics=("arbitrary", "arbitrary"),
            vmem_limit_bytes=vmem_limit_bytes,
        ),
    )(adj_arg, xw1_bf, onehot, b1, w2, b2, w3, b3, w4, b4)


def _init_linear(key, fan_in, fan_out):
    # deterministic synthetic init (PyTorch-ish uniform bound), stored as (in, out)
    kw, kb = jax.random.split(key)
    bound = 1.0 / jnp.sqrt(fan_in)
    w = jax.random.uniform(kw, (fan_in, fan_out), jnp.float32, -bound, bound)
    b = jax.random.uniform(kb, (1, fan_out), jnp.float32, -bound, bound)
    return w, b


def _reference_f32(x_in, adj, idx, params, num_graphs):
    (w1, b1), (w2, b2), (w3, b3), (w4, b4) = params
    adj_t = adj + jnp.eye(adj.shape[0], dtype=adj.dtype)
    z1 = jax.nn.relu(adj_t @ x_in @ w1 + b1)
    x2 = adj_t @ z1 @ w2 + b2
    pooled = jnp.zeros((num_graphs, x2.shape[1]), x2.dtype).at[idx].add(x2)
    zg = jax.nn.relu(pooled @ w3 + b3)
    logits = zg @ w4 + b4
    return jax.nn.log_softmax(logits, axis=1)


def _reference_mixed(x_in, adj, idx, params, num_graphs):
    # mirrors the kernel's mixed precision (bf16 MXU operands, f32 accumulation)
    f32, bf16 = jnp.float32, jnp.bfloat16
    (w1, b1), (w2, b2), (w3, b3), (w4, b4) = params
    a = adj.astype(bf16)
    xw1 = (x_in @ w1).astype(bf16)
    z1 = jax.nn.relu(jnp.dot(a, xw1, preferred_element_type=f32)
                     + xw1.astype(f32) + b1)
    z1w2 = jnp.dot(z1, w2, preferred_element_type=f32).astype(bf16)
    x2 = jnp.dot(a, z1w2, preferred_element_type=f32) + z1w2.astype(f32) + b2
    onehot = (idx[:, None] == jnp.arange(num_graphs)[None, :]).astype(f32)
    pooled = jnp.dot(onehot.T, x2, preferred_element_type=f32)
    zg = jax.nn.relu(jnp.dot(pooled, w3, preferred_element_type=f32) + b3)
    logits = jnp.dot(zg, w4, preferred_element_type=f32) + b4
    return jax.nn.log_softmax(logits, axis=1)


if __name__ == "__main__":
    key = jax.random.PRNGKey(0)
    N, D = 64, 8                 # nodes, input_dim
    H1, H2, H3, C = 32, 32, 32, 4
    G = 2                        # number of graphs (max(idx)+1)

    k_x, k_a, k1, k2, k3, k4 = jax.random.split(key, 6)
    x_in = jax.random.normal(k_x, (N, D), jnp.float32)
    # symmetric 0/1 adjacency, zero diagonal
    a = (jax.random.uniform(k_a, (N, N)) > 0.85).astype(jnp.float32)
    adj = jnp.clip(a + a.T, 0.0, 1.0) * (1.0 - jnp.eye(N, dtype=jnp.float32))
    idx = jnp.concatenate([jnp.zeros(N // 2, jnp.int32),
                           jnp.ones(N - N // 2, jnp.int32)])

    params = (_init_linear(k1, D, H1), _init_linear(k2, H1, H2),
              _init_linear(k3, H2, H3), _init_linear(k4, H3, C))

    ref_mixed = _reference_mixed(x_in, adj, idx, params, G)
    ref_f32 = _reference_f32(x_in, adj, idx, params, G)

    # Path 1: VMEM-resident bf16 adjacency (auto-selected for this small N).
    out_res = jax.block_until_ready(gnn_forward(x_in, adj, idx, params, G, tile_m=32))
    assert out_res.shape == (G, C)
    assert jnp.allclose(out_res, ref_mixed, atol=5e-3, rtol=5e-3), \
        "resident path: mismatch vs mixed-precision reference"
    assert jnp.allclose(out_res, ref_f32, atol=1e-1, rtol=1e-1), \
        "resident path: mismatch vs f32 reference"

    # Path 2: force the streamed int8-adjacency path (the large-N code path).
    out_str = jax.block_until_ready(
        gnn_forward(x_in, adj, idx, params, G, tile_m=32, adj_resident=False))
    assert jnp.allclose(out_str, ref_mixed, atol=5e-3, rtol=5e-3), \
        "streamed path: mismatch vs mixed-precision reference"
    assert jnp.allclose(out_str, ref_f32, atol=1e-1, rtol=1e-1), \
        "streamed path: mismatch vs f32 reference"

    print("KERNEL_OK")
</pallas_src>

<mosaic_0001>
module attributes {stable_mosaic.version = 11 : i64} {
  func.func @_gnn_kernel(%arg0: i32, %arg1: i32, %arg2: memref<64x64xbf16, #tpu.memory_space<vmem>>, %arg3: memref<64x32xbf16, #tpu.memory_space<vmem>>, %arg4: memref<32x2xf32, #tpu.memory_space<vmem>>, %arg5: memref<1x32xf32, #tpu.memory_space<vmem>>, %arg6: memref<32x32xf32, #tpu.memory_space<vmem>>, %arg7: memref<1x32xf32, #tpu.memory_space<vmem>>, %arg8: memref<32x32xf32, #tpu.memory_space<vmem>>, %arg9: memref<1x32xf32, #tpu.memory_space<vmem>>, %arg10: memref<32x4xf32, #tpu.memory_space<vmem>>, %arg11: memref<1x4xf32, #tpu.memory_space<vmem>>, %arg12: memref<2x4xf32, #tpu.memory_space<vmem>>, %arg13: memref<64x32xbf16, #tpu.memory_space<vmem>>, %arg14: memref<2x32xf32, #tpu.memory_space<vmem>>) attributes {dimension_semantics = [#tpu.dimension_semantics<arbitrary>, #tpu.dimension_semantics<arbitrary>], iteration_bounds = array<i64: 2, 2>, scalar_prefetch = 0 : i64, scratch_operands = 2 : i64, tpu.core_type = #tpu.core_type<tc>, window_params = [{pipeline_mode = #tpu.pipeline_mode<synchronous>, transform_indices = @transform_0, window_bounds = array<i64: 64, 64>}, {pipeline_mode = #tpu.pipeline_mode<synchronous>, transform_indices = @transform_1, window_bounds = array<i64: 64, 32>}, {transform_indices = @transform_2, window_bounds = array<i64: 32, 2>}, {pipeline_mode = #tpu.pipeline_mode<synchronous>, transform_indices = @transform_3, window_bounds = array<i64: 1, 32>}, {pipeline_mode = #tpu.pipeline_mode<synchronous>, transform_indices = @transform_4, window_bounds = array<i64: 32, 32>}, {pipeline_mode = #tpu.pipeline_mode<synchronous>, transform_indices = @transform_5, window_bounds = array<i64: 1, 32>}, {pipeline_mode = #tpu.pipeline_mode<synchronous>, transform_indices = @transform_6, window_bounds = array<i64: 32, 32>}, {pipeline_mode = #tpu.pipeline_mode<synchronous>, transform_indices = @transform_7, window_bounds = array<i64: 1, 32>}, {pipeline_mode = #tpu.pipeline_mode<synchronous>, transform_indices = @transform_8, window_bounds = array<i64: 32, 4>}, {pipeline_mode = #tpu.pipeline_mode<synchronous>, transform_indices = @transform_9, window_bounds = array<i64: 1, 4>}, {pipeline_mode = #tpu.pipeline_mode<synchronous>, transform_indices = @transform_10, window_bounds = array<i64: 2, 4>}]} {
    %c32_i32 = arith.constant 32 : i32
    %0 = arith.muli %arg1, %c32_i32 : i32
    %1 = tpu.assume_multiple %0, 32 : i32
    %2 = arith.index_cast %1 : i32 to index
    %c0 = arith.constant 0 : index
    %3 = vector.load %arg2[%2, %c0] : memref<64x64xbf16, #tpu.memory_space<vmem>>, vector<32x64xbf16>
    %c0_i32 = arith.constant 0 : i32
    %4 = arith.cmpi eq, %arg0, %c0_i32 : i32
    %5 = arith.extui %4 : i1 to i32
    %c0_i32_0 = arith.constant 0 : i32
    %6 = arith.cmpi ne, %5, %c0_i32_0 : i32
    scf.if %6 {
      %c0_2 = arith.constant 0 : index
      %c0_3 = arith.constant 0 : index
      %10 = vector.load %arg3[%c0_2, %c0_3] : memref<64x32xbf16, #tpu.memory_space<vmem>>, vector<64x32xbf16>
      %cst = arith.constant dense<0.000000e+00> : vector<32x32xf32>
      %11 = tpu.matmul %3, %10, %cst {dimension_numbers = #tpu.dot_dimension_numbers<[1], [0], [0], [1], [0, 0, 1, 1], [], []>} : vector<32x64xbf16>, vector<64x32xbf16>, vector<32x32xf32> -> vector<32x32xf32>
      %12 = arith.index_cast %1 : i32 to index
      %c0_4 = arith.constant 0 : index
      %13 = vector.load %arg3[%12, %c0_4] : memref<64x32xbf16, #tpu.memory_space<vmem>>, vector<32x32xbf16>
      %14 = arith.extf %13 : vector<32x32xbf16> to vector<32x32xf32>
      %15 = arith.addf %11, %14 : vector<32x32xf32>
      %c0_5 = arith.constant 0 : index
      %c0_6 = arith.constant 0 : index
      %16 = vector.load %arg5[%c0_5, %c0_6] : memref<1x32xf32, #tpu.memory_space<vmem>>, vector<1x32xf32>
      %17 = vector.broadcast %16 : vector<1x32xf32> to vector<32x32xf32>
      %18 = arith.addf %15, %17 : vector<32x32xf32>
      %cst_7 = arith.constant 0.000000e+00 : f32
      %19 = vector.broadcast %cst_7 : f32 to vector<32x32xf32>
      %20 = arith.maximumf %18, %19 : vector<32x32xf32>
      %c0_8 = arith.constant 0 : index
      %c0_9 = arith.constant 0 : index
      %21 = vector.load %arg6[%c0_8, %c0_9] : memref<32x32xf32, #tpu.memory_space<vmem>>, vector<32x32xf32>
      %cst_10 = arith.constant dense<0.000000e+00> : vector<32x32xf32>
      %22 = tpu.matmul %20, %21, %cst_10 {dimension_numbers = #tpu.dot_dimension_numbers<[1], [0], [0], [1], [0, 0, 1, 1], [], []>} : vector<32x32xf32>, vector<32x32xf32>, vector<32x32xf32> -> vector<32x32xf32>
      %23 = arith.truncf %22 : vector<32x32xf32> to vector<32x32xbf16>
      %24 = arith.index_cast %1 : i32 to index
      %c0_11 = arith.constant 0 : index
      %25 = vector.load %arg13[%24, %c0_11] : memref<64x32xbf16, #tpu.memory_space<vmem>>, vector<32x32xbf16>
      tpu.vector_store %arg13[%24, %c0_11], %23 {strides = array<i32>} : memref<64x32xbf16, #tpu.memory_space<vmem>>, vector<32x32xbf16>,
    } else {
    }
    %c1_i32 = arith.constant 1 : i32
    %7 = arith.cmpi eq, %arg0, %c1_i32 : i32
    %8 = arith.extui %7 : i1 to i32
    %c0_i32_1 = arith.constant 0 : i32
    %9 = arith.cmpi ne, %8, %c0_i32_1 : i32
    scf.if %9 {
      %c0_i32_2 = arith.constant 0 : i32
      %10 = arith.cmpi eq, %arg1, %c0_i32_2 : i32
      %11 = arith.extui %10 : i1 to i32
      %c0_i32_3 = arith.constant 0 : i32
      %12 = arith.cmpi ne, %11, %c0_i32_3 : i32
      scf.if %12 {
        %cst_18 = arith.constant 0.000000e+00 : f32
        %30 = vector.broadcast %cst_18 : f32 to vector<2x32xf32>
        %c0_19 = arith.constant 0 : index
        %c0_20 = arith.constant 0 : index
        %31 = vector.load %arg14[%c0_19, %c0_20] : memref<2x32xf32, #tpu.memory_space<vmem>>, vector<2x32xf32>
        tpu.vector_store %arg14[%c0_19, %c0_20], %30 {strides = array<i32>} : memref<2x32xf32, #tpu.memory_space<vmem>>, vector<2x32xf32>,
      } else {
      }
      %c0_4 = arith.constant 0 : index
      %c0_5 = arith.constant 0 : index
      %13 = vector.load %arg13[%c0_4, %c0_5] : memref<64x32xbf16, #tpu.memory_space<vmem>>, vector<64x32xbf16>
      %cst = arith.constant dense<0.000000e+00> : vector<32x32xf32>
      %14 = tpu.matmul %3, %13, %cst {dimension_numbers = #tpu.dot_dimension_numbers<[1], [0], [0], [1], [0, 0, 1, 1], [], []>} : vector<32x64xbf16>, vector<64x32xbf16>, vector<32x32xf32> -> vector<32x32xf32>
      %15 = arith.index_cast %1 : i32 to index
      %c0_6 = arith.constant 0 : index
      %16 = vector.load %arg13[%15, %c0_6] : memref<64x32xbf16, #tpu.memory_space<vmem>>, vector<32x32xbf16>
      %17 = arith.extf %16 : vector<32x32xbf16> to vector<32x32xf32>
      %18 = arith.addf %14, %17 : vector<32x32xf32>
      %c0_7 = arith.constant 0 : index
      %c0_8 = arith.constant 0 : index
      %19 = vector.load %arg7[%c0_7, %c0_8] : memref<1x32xf32, #tpu.memory_space<vmem>>, vector<1x32xf32>
      %20 = vector.broadcast %19 : vector<1x32xf32> to vector<32x32xf32>
      %21 = arith.addf %18, %20 : vector<32x32xf32>
      %c0_9 = arith.constant 0 : index
      %c0_10 = arith.constant 0 : index
      %22 = vector.load %arg14[%c0_9, %c0_10] : memref<2x32xf32, #tpu.memory_space<vmem>>, vector<2x32xf32>
      %c0_11 = arith.constant 0 : index
      %c0_12 = arith.constant 0 : index
      %23 = vector.load %arg4[%c0_11, %c0_12] : memref<32x2xf32, #tpu.memory_space<vmem>>, vector<32x2xf32>
      %cst_13 = arith.constant dense<0.000000e+00> : vector<2x32xf32>
      %24 = tpu.matmul %23, %21, %cst_13 {dimension_numbers = #tpu.dot_dimension_numbers<[0], [0], [1], [1], [0, 1, 1, 1], [], []>} : vector<32x2xf32>, vector<32x32xf32>, vector<2x32xf32> -> vector<2x32xf32>
      %25 = arith.addf %22, %24 : vector<2x32xf32>
      %c0_14 = arith.constant 0 : index
      %c0_15 = arith.constant 0 : index
      %26 = vector.load %arg14[%c0_14, %c0_15] : memref<2x32xf32, #tpu.memory_space<vmem>>, vector<2x32xf32>
      tpu.vector_store %arg14[%c0_14, %c0_15], %25 {strides = array<i32>} : memref<2x32xf32, #tpu.memory_space<vmem>>, vector<2x32xf32>,
      %c1_i32_16 = arith.constant 1 : i32
      %27 = arith.cmpi eq, %arg1, %c1_i32_16 : i32
      %28 = arith.extui %27 : i1 to i32
      %c0_i32_17 = arith.constant 0 : i32
      %29 = arith.cmpi ne, %28, %c0_i32_17 : i32
      scf.if %29 {
        %c0_18 = arith.constant 0 : index
        %c0_19 = arith.constant 0 : index
        %30 = vector.load %arg14[%c0_18, %c0_19] : memref<2x32xf32, #tpu.memory_space<vmem>>, vector<2x32xf32>
        %c0_20 = arith.constant 0 : index
        %c0_21 = arith.constant 0 : index
        %31 = vector.load %arg8[%c0_20, %c0_21] : memref<32x32xf32, #tpu.memory_space<vmem>>, vector<32x32xf32>
        %cst_22 = arith.constant dense<0.000000e+00> : vector<2x32xf32>
        %32 = tpu.matmul %30, %31, %cst_22 {dimension_numbers = #tpu.dot_dimension_numbers<[1], [0], [0], [1], [0, 0, 1, 1], [], []>} : vector<2x32xf32>, vector<32x32xf32>, vector<2x32xf32> -> vector<2x32xf32>
        %c0_23 = arith.constant 0 : index
        %c0_24 = arith.constant 0 : index
        %33 = vector.load %arg9[%c0_23, %c0_24] : memref<1x32xf32, #tpu.memory_space<vmem>>, vector<1x32xf32>
        %34 = vector.broadcast %33 : vector<1x32xf32> to vector<2x32xf32>
        %35 = arith.addf %32, %34 : vector<2x32xf32>
        %cst_25 = arith.constant 0.000000e+00 : f32
        %36 = vector.broadcast %cst_25 : f32 to vector<2x32xf32>
        %37 = arith.maximumf %35, %36 : vector<2x32xf32>
        %c0_26 = arith.constant 0 : index
        %c0_27 = arith.constant 0 : index
        %38 = vector.load %arg10[%c0_26, %c0_27] : memref<32x4xf32, #tpu.memory_space<vmem>>, vector<32x4xf32>
        %cst_28 = arith.constant dense<0.000000e+00> : vector<2x4xf32>
        %39 = tpu.matmul %37, %38, %cst_28 {dimension_numbers = #tpu.dot_dimension_numbers<[1], [0], [0], [1], [0, 0, 1, 1], [], []>} : vector<2x32xf32>, vector<32x4xf32>, vector<2x4xf32> -> vector<2x4xf32>
        %c0_29 = arith.constant 0 : index
        %c0_30 = arith.constant 0 : index
        %40 = vector.load %arg11[%c0_29, %c0_30] : memref<1x4xf32, #tpu.memory_space<vmem>>, vector<1x4xf32>
        %41 = vector.broadcast %40 : vector<1x4xf32> to vector<2x4xf32>
        %42 = arith.addf %39, %41 : vector<2x4xf32>
        %cst_31 = arith.constant dense<0xFF800000> : vector<2xf32>
        %43 = vector.multi_reduction <maximumf>, %42, %cst_31 [1] : vector<2x4xf32> to vector<2xf32>
        %44 = vector.shape_cast %43 : vector<2xf32> to vector<2x1xf32>
        %45 = vector.broadcast %44 : vector<2x1xf32> to vector<2x4xf32>
        %46 = arith.subf %42, %45 : vector<2x4xf32>
        %47 = math.exp %46 : vector<2x4xf32>
        %cst_32 = arith.constant dense<0.000000e+00> : vector<2xf32>
        %48 = vector.multi_reduction <add>, %47, %cst_32 [1] : vector<2x4xf32> to vector<2xf32>
        %49 = vector.shape_cast %48 : vector<2xf32> to vector<2x1xf32>
        %50 = math.log %49 : vector<2x1xf32>
        %51 = vector.broadcast %50 : vector<2x1xf32> to vector<2x4xf32>
        %52 = arith.subf %46, %51 : vector<2x4xf32>
        %c0_33 = arith.constant 0 : index
        %c0_34 = arith.constant 0 : index
        %53 = vector.load %arg12[%c0_33, %c0_34] : memref<2x4xf32, #tpu.memory_space<vmem>>, vector<2x4xf32>
        tpu.vector_store %arg12[%c0_33, %c0_34], %52 {strides = array<i32>} : memref<2x4xf32, #tpu.memory_space<vmem>>, vector<2x4xf32>,
      } else {
      }
    } else {
    }
    return
  }
  func.func @transform_0(%arg0: i32, %arg1: i32) -> (i32, i32) {
    %c0_i32 = arith.constant 0 : i32
    %c0_i32_0 = arith.constant 0 : i32
    %c0_i32_1 = arith.constant 0 : i32
    return %c0_i32, %c0_i32_0 : i32, i32
  }
  func.func @transform_1(%arg0: i32, %arg1: i32) -> (i32, i32) {
    %c0_i32 = arith.constant 0 : i32
    %c0_i32_0 = arith.constant 0 : i32
    %c0_i32_1 = arith.constant 0 : i32
    return %c0_i32, %c0_i32_0 : i32, i32
  }
  func.func @transform_2(%arg0: i32, %arg1: i32) -> (i32, i32) {
    %c0_i32 = arith.constant 0 : i32
    %c0_i32_0 = arith.constant 0 : i32
    return %arg1, %c0_i32 : i32, i32
  }
  func.func @transform_3(%arg0: i32, %arg1: i32) -> (i32, i32) {
    %c0_i32 = arith.constant 0 : i32
    %c0_i32_0 = arith.constant 0 : i32
    %c0_i32_1 = arith.constant 0 : i32
    return %c0_i32, %c0_i32_0 : i32, i32
  }
  func.func @transform_4(%arg0: i32, %arg1: i32) -> (i32, i32) {
    %c0_i32 = arith.constant 0 : i32
    %c0_i32_0 = arith.constant 0 : i32
    %c0_i32_1 = arith.constant 0 : i32
    return %c0_i32, %c0_i32_0 : i32, i32
  }
  func.func @transform_5(%arg0: i32, %arg1: i32) -> (i32, i32) {
    %c0_i32 = arith.constant 0 : i32
    %c0_i32_0 = arith.constant 0 : i32
    %c0_i32_1 = arith.constant 0 : i32
    return %c0_i32, %c0_i32_0 : i32, i32
  }
  func.func @transform_6(%arg0: i32, %arg1: i32) -> (i32, i32) {
    %c0_i32 = arith.constant 0 : i32
    %c0_i32_0 = arith.constant 0 : i32
    %c0_i32_1 = arith.constant 0 : i32
    return %c0_i32, %c0_i32_0 : i32, i32
  }
  func.func @transform_7(%arg0: i32, %arg1: i32) -> (i32, i32) {
    %c0_i32 = arith.constant 0 : i32
    %c0_i32_0 = arith.constant 0 : i32
    %c0_i32_1 = arith.constant 0 : i32
    return %c0_i32, %c0_i32_0 : i32, i32
  }
  func.func @transform_8(%arg0: i32, %arg1: i32) -> (i32, i32) {
    %c0_i32 = arith.constant 0 : i32
    %c0_i32_0 = arith.constant 0 : i32
    %c0_i32_1 = arith.constant 0 : i32
    return %c0_i32, %c0_i32_0 : i32, i32
  }
  func.func @transform_9(%arg0: i32, %arg1: i32) -> (i32, i32) {
    %c0_i32 = arith.constant 0 : i32
    %c0_i32_0 = arith.constant 0 : i32
    %c0_i32_1 = arith.constant 0 : i32
    return %c0_i32, %c0_i32_0 : i32, i32
  }
  func.func @transform_10(%arg0: i32, %arg1: i32) -> (i32, i32) {
    %c0_i32 = arith.constant 0 : i32
    %c0_i32_0 = arith.constant 0 : i32
    %c0_i32_1 = arith.constant 0 : i32
    return %c0_i32, %c0_i32_0 : i32, i32
  }
}

</mosaic_0001>

<bundles_post_ra>
// kernel: tpu_custom_call.1
= control target key start
LH: loop header
LB: loop body
LE: loop exit
PB: predicated region body
PF: predicated region fallthrough
CT: control target
= control target key end

     0   :  { %15 = vsyncpa [#allocation5], 0  ;;  %s1454_s13 = smov 0   ;;  %s1456_s14 = smov 0   ;;  %s1652_s0 = inlined_call_operand.vmem [shape: bf16[64,64], index: 0, kind: input, shape index: {}]   ;;  %s1653_s1 = inlined_call_operand.vmem [shape: bf16[64,32], index: 1, kind: input, shape index: {}]   ;;  %s1654_s2 = inlined_call_operand.vmem [shape: f32[64,2], index: 2, kind: input, shape index: {}]   ;;  %s1655_s3 = inlined_call_operand.vmem [shape: f32[1,32], index: 3, kind: input, shape index: {}]   ;;  %s1656_s4 = inlined_call_operand.vmem [shape: f32[32,32], index: 4, kind: input, shape index: {}]   ;;  %s1657_s5 = inlined_call_operand.vmem [shape: f32[1,32], index: 5, kind: input, shape index: {}]   ;;  %s1658_s6 = inlined_call_operand.vmem [shape: f32[32,32], index: 6, kind: input, shape index: {}]   ;;  %s1659_s7 = inlined_call_operand.vmem [shape: f32[1,32], index: 7, kind: input, shape index: {}]   ;;  %s1660_s8 = inlined_call_operand.vmem [shape: f32[32,4], index: 8, kind: input, shape index: {}]   ;;  %s1661_s9 = inlined_call_operand.vmem [shape: f32[1,4], index: 9, kind: input, shape index: {}]   ;;  %s1662_s10 = inlined_call_operand.hbm [shape: f32[2,4], index: 10, kind: output, shape index: {}]  }
   0x1   :  { %s1458_s15 = smov 0   ;;  %s1460_s16 = smov 0  }
   0x2   :  { %s1462_s17 = smov 0  }
   0x3 LB: > { %s1076_s18 = sadd.s32 4294967295, %s1389_s17   ;;  %s30_s19 = sadd.s32 1, %s1381_s15  ;;  %s1389_s17 = sphi %s1462_s17, %s21_s17   ;;  %s1385_s16 = sphi %s1460_s16, %s1667_s16   ;;  %s1381_s15 = sphi %s1458_s15, %s1666_s15   ;;  %s1377_s14 = sphi %s1456_s14, %s1665_s14   ;;  %s1373_s13 = sphi %s1454_s13, %s1664_s13  }
   0x4   : > { %p31_p0 = scmp.ge.s32.totalorder %s30_s19, 2  ;;  %s33_s20 = sadd.s32 1, %s1385_s16 }
   0x5   : > { %p1079_p1 = scmp.ge.s32.totalorder %s1389_s17, 1  ;;  %p321_p2 = scmp.lt.s32.totalorder %s1389_s17, 5 }
   0x6   : > { %s1669_s19 = smov (%p31_p0, %s30_s19), 0  ;;  %s1671_s20 = smov (!%p31_p0, %s33_s20), %s1385_s16 }
   0x7   : > { %p322_p3 = pnand %p1079_p1, %p321_p2  ;;  %p35_p4 = scmp.ge.s32.totalorder %s1671_s20, 2 }
   0x8   : > { %s1080_s21 = sshll.u32 (!%p322_p3), %s1373_s13, 2  ;;  %s1491_s22 = sshll.u32 (!%p322_p3), %s1373_s13, 5 }
   0x9   : > { %s1673_s20 = smov (%p35_p4, %s1671_s20), 0  ;;  %325 = sbr.rel (%p322_p3) target bundleno = 1730 (0x6c2), region = 60 }
   0xa   : > { %p355_p5 = scmp.lt.s32.totalorder (!%p322_p3), %s1080_s21, 7  ;;  %s362_s23 = sshra.s32 (!%p322_p3), %s1491_s22, 3 }
   0xb   : > { %s1494_s24 = sshll.u32 (!%p322_p3), %s362_s23, 2  ;;  %p1084_p6 = scmp.ne.s32.totalorder (!%p322_p3), %s1377_s14, 0 }
   0xc   : > { %s365_s27 = scalar_lea.vmem (!%p322_p3), %s1652_s0, %s1494_s24 }
   0xd   : > { %v1500_v0 = vld [vmem:[%s365_s27] sm:$0xf] (!%p322_p3)  ;;  %v1502_v1 = vld [vmem:[%s365_s27 + $0x4] sm:$0xf] (!%p322_p3)  ;;  %v1509_v2 = vld [vmem:[%s365_s27 + $0x8] sm:$0xf] (!%p322_p3) }
   0xe   : > { %v1511_v3 = vld [vmem:[%s365_s27 + $0xc] sm:$0xf] (!%p322_p3) }
  0x10   : > { %s1675_s21 = smov (!%p355_p5, %s1080_s21), 7  ;;  %373 = sbr.rel (%p1084_p6) target bundleno = 475 (0x1db), region = 64 }
  0x11   : > { %s1081_s28 = sshll.u32 %s1675_s21, 3  ;;  %v1313_v4 = vld [vmem:[%s1653_s1] sm:$0xff] (!%p1084_p6)   ;;  %v1086_v5 = vcombine.low (!%p1084_p6), %v1500_v0, %v1502_v1  ;;  %vm426_vm0 = vcmask (!%p1084_p6), 523264   ;;  %v1314_v6 = vld [vmem:[%s1653_s1 + $0x8] sm:$0xff] (!%p1084_p6)   ;;  %v1315_v7 = vld [vmem:[%s1653_s1 + $0x10] sm:$0xff] (!%p1084_p6)   ;;  %v1087_v9 = vcombine.low (!%p1084_p6), %v1509_v2, %v1511_v3  ;;  %s383_s12 = scalar_lea.vmem (!%p1084_p6), %s1653_s1, %s1494_s24  ;;  %vm501_vm1 = vcmask (!%p1084_p6), 261120  }
  0x12   : > { %s1507_s11 = scalar_lea.vmem %s1654_s2, %s1081_s28  ;;  %1162 = vmatprep.subr.bf16.mxu0 (!%p1084_p6), %v1313_v4  ;;  %v1316_v8 = vld [vmem:[%s1653_s1 + $0x18] sm:$0xff] (!%p1084_p6)   ;;  %v497_v10 = vld [vmem:[%s1656_s4] sm:$0xff] (!%p1084_p6)  ;;  %v498_v11 = vld [vmem:[%s1656_s4 + $0x8] sm:$0xff] (!%p1084_p6)  ;;  %s601_s24 = sshra.s32 (!%p1084_p6), %s1491_s22, 4 }
  0x13   : > { %1170 = vmatprep.mubr.msk.bf16.mxu0 (!%p1084_p6), %vm426_vm0, %v1086_v5  ;;  %1163 = vmatpush3.bf16.msra.mxu0 (!%p1084_p6), %v1313_v4  ;;  %v1233_v12 = vpack.c.bf16 (!%p1084_p6), %v498_v11, %v497_v10  ;;  %v499_v13 = vld [vmem:[%s1656_s4 + $0x10] sm:$0xff] (!%p1084_p6)  ;;  %v500_v14 = vld [vmem:[%s1656_s4 + $0x18] sm:$0xff] (!%p1084_p6)  ;;  %v1126_v16 = vld [vmem:[%s383_s12 + $0x8] sm:$0xff] (!%p1084_p6)   ;;  %s1099_s25 = sshll.u32 (!%p1084_p6), %s601_s24, 3 }
  0x14   : > { %1164 = vmatprep.subr.bf16.mxu0 (!%p1084_p6), %v1314_v6  ;;  %v1237_v15 = vpack.c.bf16 (!%p1084_p6), %v500_v14, %v499_v13  ;;  %v1119_v17 = vld [vmem:[%s383_s12] sm:$0xff] (!%p1084_p6)   ;;  %v1124_v18 = vunpack.c.l.bf16 (!%p1084_p6), %v1126_v16  ;;  %v1125_v21 = vunpack.c.h.bf16 (!%p1084_p6), %v1126_v16  ;;  %s604_s26 = scalar_lea.vmem (!%p1084_p6), [#allocation2], %s1099_s25 }
  0x15   : > { %1234 = vmatprep.subr.bf16.mxu1 (!%p1084_p6), %v1233_v12  ;;  %v1120_v19 = vunpack.c.l.bf16 (!%p1084_p6), %v1119_v17  ;;  %v1121_v22 = vunpack.c.h.bf16 (!%p1084_p6), %v1119_v17  ;;  %v1094_v24 = vld [vmem:[%s1655_s3] ss:$0 sm:$0xff] (!%p1084_p6) }
  0x16   : > { %1236 = vmatpush3.bf16.msra.mxu1 (!%p1084_p6), %v1233_v12 }
  0x17   : > { %1165 = vmatpush3.bf16.msra.mxu0 %v1314_v6  ;;  %1238 = vmatprep.subr.bf16.mxu1 %v1237_v15 }
  0x18   : > { %1166 = vmatprep.subr.bf16.mxu0 %v1315_v7 }
  0x1a   : > { %1240 = vmatpush3.bf16.msra.mxu1 %v1237_v15 }
  0x1b   : > { %1167 = vmatpush3.bf16.msra.mxu0 %v1315_v7 }
  0x1c   : > { %1168 = vmatprep.subr.bf16.mxu0 %v1316_v8 }
  0x1f   : > { %1169 = vmatpush3.bf16.msra.mxu0 %v1316_v8 }
  0x22   : > { %1171 = vmatmul.mubr.msk.bf16.vlgmr.msra.gmra.mrb[0].mxu0 %vm426_vm0, %v1087_v9 }
  0xf5   : > { %v1172_v20 = vpop.f32.mrb[0].mxu0 }
  0xf6   : > { %v476_v23 = vadd.f32 %v1172_v20, %v1124_v18  ;;  %v467_v25 = vpop.f32.mrb[1].mxu0 }
  0xf7   : > { %v468_v26 = vadd.f32 %v1120_v19, %v467_v25  ;;  %v1173_v27 = vpop.f32.mrb[2].mxu0 }
  0xf8   : > { %v470_v28 = vpop.f32.mrb[3].mxu0  ;;  %v479_v29 = vadd.f32 %v1173_v27, %v1125_v21  ;;  %v491_v32 = vadd.f32 %v1094_v24, %v476_v23 }
  0xf9   : > { %v471_v30 = vadd.f32 %v1121_v22, %v470_v28  ;;  %v489_v31 = vadd.f32 %v1094_v24, %v468_v26 }
  0xfa   : > { %v492_v35 = vadd.f32 %v1094_v24, %v479_v29  ;;  %v495_v37 = vmax.f32 %v491_v32, 0.0 }
  0xfb   : > { %v490_v33 = vadd.f32 %v1094_v24, %v471_v30  ;;  %v493_v34 = vmax.f32 %v489_v31, 0.0 }
  0xfc   : > { %v496_v38 = vmax.f32 %v492_v35, 0.0 }
  0xfd   : > { %v494_v36 = vmax.f32 %v490_v33, 0.0  ;;  %1182 = vmatprep.mubr.msk.f32.mxu1 %vm501_vm1, %v493_v34 }
  0xff   : > { %1183 = vmatmul.mubr.msk.f32.vlgmr.msra.gmra.mrb[0].mxu1 %vm501_vm1, %v494_v36 }
 0x100   : > { %1185 = vmatprep.mubr.msk.f32.mxu1 %vm501_vm1, %v495_v37 }
 0x103   : > { %1186 = vmatmul.mubr.msk.f32.gmra.mrb[2].mxu1 %vm501_vm1, %v496_v38 }
 0x1d2   : > { %v1184_v39 = vpop.f32.mrb[0].mxu1 }
 0x1d3   : > { %v580_v40 = vpop.f32.mrb[1].mxu1 }
 0x1d4   : > { %v599_v41 = vpack.c.bf16 %v1184_v39, %v580_v40 }
 0x1d6   : > { %605 = vst.msk [vmem:[%s604_s26] sm:$0xff] %vm501_vm1, %v599_v41  ;;  %v1187_v42 = vpop.f32.mrb[2].mxu1 }
 0x1d7   : > { %v590_v43 = vpop.f32.mrb[3].mxu1 }
 0x1d8   : > { %v600_v44 = vpack.c.bf16 %v1187_v42, %v590_v43 }
 0x1da   : > { %606 = vst.msk [vmem:[%s604_s26 + $0x8] sm:$0xff] %vm501_vm1, %v600_v44 }
 0x1db PF: > { %p1100_p7 = scmp.ne.s32.totalorder %s1377_s14, 1 }
 0x1dc   : > { %p1101_p8 = scmp.ne.s32.totalorder (!%p1100_p7), %s1373_s13, 0 }
 0x1dd   : > { %610 = sbr.rel (%p1100_p7) target bundleno = 1705 (0x6a9), region = 68 }
 0x1e4   : > { %614 = sbr.rel (%p1101_p8) target bundleno = 491 (0x1eb), region = 72  ;;  %vm615_vm2 = vcmask (!%p1101_p8), 254976   ;;  %v1391_v45 = vmov (!%p1101_p8), 0.0  }
 0x1e5   : > { %616 = vst.msk [vmem:[#allocation3] sm:$0x3] (!%p1101_p8), %vm615_vm2, %v1391_v45 }
 0x1eb PF: > { %v617_v46 = vld [vmem:[#allocation2] sm:$0xff]  ;;  %v618_v47 = vld [vmem:[#allocation2 + $0x8] sm:$0xff]  ;;  %v1103_v48 = vcombine.low %v1500_v0, %v1502_v1  ;;  %vm641_vm3 = vcmask 523264   ;;  %v619_v50 = vld [vmem:[#allocation2 + $0x10] sm:$0xff]  ;;  %v1104_v55 = vcombine.low %v1509_v2, %v1511_v3  ;;  %v1392_v56 = vmov 0.0|0.0   ;;  %s621_s14 = sshra.s32 %s1491_s22, 4 }
 0x1ec   : > { %1188 = vmatprep.subr.bf16.mxu0 %v617_v46  ;;  %v709_v49 = vld [vmem:[%s1507_s11] sm:$0xff]  ;;  %v710_v51 = vld [vmem:[%s1507_s11 + $0x8] sm:$0xff]  ;;  %v620_v52 = vld [vmem:[#allocation2 + $0x18] sm:$0xff]  ;;  %1241 = vmatprep.subr.bf16.mxu1 %v1392_v56  ;;  %vm1393_vm4 = vmmov 0   ;;  %v1394_v57 = vmov 0.0   ;;  %s1102_s27 = sshll.u32 %s621_s14, 3 }
 0x1ed   : > { %1189 = vmatpush3.bf16.msra.mxu0 %v617_v46  ;;  %1196 = vmatprep.mubr.msk.bf16.mxu0 %vm641_vm3, %v1103_v48  ;;  %v711_v53 = vld [vmem:[%s1507_s11 + $0x10] sm:$0xff]  ;;  %v712_v54 = vld [vmem:[%s1507_s11 + $0x18] sm:$0xff]  ;;  %s624_s28 = scalar_lea.vmem [#allocation2], %s1102_s27  ;;  %v1107_v3 = vld [vmem:[%s1657_s5] ss:$0 sm:$0xff]  ;;  %vm745_vm5 = vcmask 261120  }
 0x1ee   : > { %1190 = vmatprep.subr.bf16.mxu0 %v618_v47  ;;  %713 = vxpose.xlu0.b32.start [1/4] (short) (narrow) %v709_v49, 8  ;;  %v626_v58 = vld [vmem:[%s624_s28 + $0x8] sm:$0xff]  ;;  %v625_v59 = vld [vmem:[%s624_s28] sm:$0xff]  ;;  %vm820_vm6 = vcmask 254976   ;;  %p1109_p9 = scmp.ne.s32.totalorder %s1373_s13, 1 }
 0x1ef   : > { %1208 = vmatprep.mubr.msk.f32.mxu1 %vm1393_vm4, %v1394_v57  ;;  %v629_v60 = vunpack.c.l.bf16 %v626_v58  ;;  %v627_v61 = vunpack.c.l.bf16 %v625_v59  ;;  %v630_v62 = vunpack.c.h.bf16 %v626_v58  ;;  %v628_v0 = vunpack.c.h.bf16 %v625_v59  ;;  %v708_v16 = vld [vmem:[#allocation3] sm:$0x3]  ;;  %v828_v21 = vld [vmem:[%s1658_s6 + $0x8] sm:$0xff] (!%p1109_p9)  ;;  %v829_v22 = vld [vmem:[%s1658_s6 + $0x10] sm:$0xff] (!%p1109_p9) }
 0x1f0   : > { %v827_v20 = vld [vmem:[%s1658_s6] sm:$0xff] (!%p1109_p9)  ;;  %v1395_v23 = vmov (!%p1109_p9), 0.0|0.0   ;;  %v830_v25 = vld [vmem:[%s1658_s6 + $0x18] sm:$0xff] (!%p1109_p9)  ;;  %vm1396_vm7 = vmmov (!%p1109_p9), 0   ;;  %v1397_v26 = vmov (!%p1109_p9), 0.0   ;;  %v913_v28 = vld [vmem:[%s1660_s8 + $0x8] sm:$0xff] (!%p1109_p9) }
 0x1f1   : > { %1191 = vmatpush3.bf16.msra.mxu0 %v618_v47  ;;  %v1248_v24 = vpack.c.bf16 (!%p1109_p9), %v828_v21, %v827_v20  ;;  %v912_v27 = vld [vmem:[%s1660_s8] sm:$0xff] (!%p1109_p9)  ;;  %v1251_v29 = vpack.c.bf16 (!%p1109_p9), %v830_v25, %v829_v22  ;;  %v914_v32 = vld [vmem:[%s1660_s8 + $0x10] sm:$0xff] (!%p1109_p9)  ;;  %v915_v33 = vld [vmem:[%s1660_s8 + $0x18] sm:$0xff] (!%p1109_p9)  ;;  %vm996_vm8 = vcmask (!%p1109_p9), 25600  }
 0x1f2   : > { %1192 = vmatprep.subr.bf16.mxu0 %v619_v50  ;;  %714 = vxpose.xlu0.b32.cont [2/4] (short) (narrow) %v710_v51, 8  ;;  %v1254_v30 = vpack.c.bf16 (!%p1109_p9), %v913_v28, %v912_v27  ;;  %v1257_v34 = vpack.c.bf16 (!%p1109_p9), %v915_v33, %v914_v32  ;;  %v1110_v35 = vld [vmem:[%s1659_s7] ss:$0 sm:$0xff] (!%p1109_p9) }
 0x1f3   : > { %v1112_v40 = vld [vmem:[%s1661_s9] ss:$0 sm:$0xff] (!%p1109_p9) }
 0x1f5   : > { %1193 = vmatpush3.bf16.msra.mxu0 %v619_v50 }
 0x1f6   : > { %1194 = vmatprep.subr.bf16.mxu0 %v620_v52  ;;  %715 = vxpose.xlu0.b32.cont [3/4] (short) (narrow) %v711_v53, 8 }
 0x1f9   : > { %1195 = vmatpush3.bf16.msra.mxu0 %v620_v52 }
 0x1fa   : > { %716 = vxpose.xlu0.b32.end [4/4] (short) (narrow) %v712_v54, 8  ;;  %1247 = vmatprep.subr.bf16.mxu0 (!%p1109_p9), %v1395_v23 }
 0x1fc   : > { %1197 = vmatmul.mubr.msk.bf16.vlgmr.msra.gmra.mrb[0].mxu0 %vm641_vm3, %v1104_v55 }
 0x1fd   : > { %1219 = vmatprep.mubr.msk.f32.mxu0 (!%p1109_p9), %vm1396_vm7, %v1397_v26  ;;  %1249 = vmatpush3.bf16.msra.mxu0 (!%p1109_p9), %v1248_v24 }
 0x1fe   : > { %1250 = vmatprep.subr.bf16.mxu0 (!%p1109_p9), %v1395_v23 }
 0x201   : > { %1252 = vmatpush3.bf16.msra.mxu0 (!%p1109_p9), %v1251_v29 }
 0x26e   : > { %v729_v15 = vpop.trf.xlu0 }
 0x2cf   : > { %v1198_v63 = vpop.f32.mrb[0].mxu0 }
 0x2d0   : > { %v691_v1 = vadd.f32 %v1198_v63, %v629_v60  ;;  %v682_v2 = vpop.f32.mrb[1].mxu0 }
 0x2d1   : > { %v683_v4 = vadd.f32 %v682_v2, %v627_v61  ;;  %v1199_v5 = vpop.f32.mrb[2].mxu0 }
 0x2d2   : > { %v694_v6 = vadd.f32 %v1199_v5, %v630_v62  ;;  %v685_v7 = vpop.f32.mrb[3].mxu0  ;;  %v706_v9 = vadd.f32 %v1107_v3, %v691_v1 }
 0x2d3   : > { %v686_v8 = vadd.f32 %v685_v7, %v628_v0  ;;  %v704_v11 = vadd.f32 %v1107_v3, %v683_v4 }
 0x2d4   : > { %v707_v10 = vadd.f32 %v1107_v3, %v694_v6 }
 0x2d5   : > { %v705_v12 = vadd.f32 %v1107_v3, %v686_v8 }
 0x2d6   : > { %v1245_v13 = vpack.c.bf16 %v707_v10, %v706_v9 }
 0x2d7   : > { %v1242_v14 = vpack.c.bf16 %v705_v12, %v704_v11 }
 0x2d9   : > { %1243 = vmatpush3.bf16.msra.mxu1 %v1242_v14 }
 0x2da   : > { %1244 = vmatprep.subr.bf16.mxu1 %v1392_v56 }
 0x2dd   : > { %1246 = vmatpush3.bf16.msra.mxu1 %v1245_v13 }
 0x2de   : > { %1253 = vmatprep.subr.bf16.mxu1 (!%p1109_p9), %v1395_v23 }
 0x2e0   : > { %1209 = vmatmul.mubr.msk.f32.vlgmr.msra.gmra.mrb[0].mxu1 %vm745_vm5, %v729_v15 }
 0x2e1   : > { %1230 = vmatprep.mubr.msk.f32.mxu1 (!%p1109_p9), %vm1396_vm7, %v1397_v26  ;;  %1255 = vmatpush3.bf16.msra.mxu1 (!%p1109_p9), %v1254_v30 }
 0x2e2   : > { %1256 = vmatprep.subr.bf16.mxu1 (!%p1109_p9), %v1395_v23 }
 0x2e5   : > { %1258 = vmatpush3.bf16.msra.mxu1 (!%p1109_p9), %v1257_v34 }
 0x3b0   : > { %825 = sbr.rel (%p1109_p9) target bundleno = 1705 (0x6a9), region = 76 }
 0x3b3   : > { %v815_v17 = vpop.f32.mrb[0].mxu1 }
 0x3b4   : > { %v819_v18 = vadd.f32 %v815_v17, %v708_v16  ;;  %v1210_v19 = vpop.f32.mrb[1].mxu1 }
 0x3b6   : > { %821 = vst.msk [vmem:[#allocation3] sm:$0x3] %vm820_vm6, %v819_v18 }
 0x3bd   : > { %v826_v31 = vld [vmem:[#allocation3] sm:$0x3] }
 0x3be   : > { %1220 = vmatmul.mubr.msk.f32.vlgmr.msra.gmra.mrb[0].mxu0 %vm745_vm5, %v826_v31 }
 0x491   : > { %v907_v36 = vpop.f32.mrb[0].mxu0 }
 0x492   : > { %v908_v37 = vadd.f32 %v1110_v35, %v907_v36  ;;  %v1221_v38 = vpop.f32.mrb[1].mxu0 }
 0x494   : > { %v911_v39 = vmax.f32 %v908_v37, 0.0 }
 0x496   : > { %1231 = vmatmul.mubr.msk.f32.vlgmr.msra.gmra.mrb[0].mxu1 %vm745_vm5, %v911_v39 }
 0x569   : > { %v992_v41 = vpop.f32.mrb[0].mxu1 }
 0x56a   : > { %v993_v42 = vadd.f32 %v1112_v40, %v992_v41  ;;  %v1232_v43 = vpop.f32.mrb[1].mxu1 }
 0x56c   : > { %v997_v44 = vsel %vm996_vm8, %v993_v42, -inf }
 0x56d   : > { %998 = vmax.xlane.f32.xlu0 %v997_v44 }
 0x5fa   : > { %v999_v45 = vpop.xlane.xlu0 %998 }
 0x5fb   : > { %v1000_v46 = vsub.f32 %v993_v42, %v999_v45 }
 0x5fd   : > { %v1001_v47 = vmul.f32 1.442695, %v1000_v46 }
 0x5ff   : > { %1317 = vpow2.f32 %v1001_v47 }
 0x609   : > { %v1318_v48 = vpop.eup %1317 }
 0x60a   : > { %v1003_v49 = vsel %vm996_vm8, %v1318_v48, 0.0 }
 0x60b   : > { %1004 = vadd.xlane.f32.xlu0 %v1003_v49 }
 0x698   : > { %v1005_v50 = vpop.xlane.xlu0 %1004 }
 0x699   : > { %1319 = vlog2.f32 %v1005_v50 }
 0x6a3   : > { %v1320_v51 = vpop.eup %1319 }
 0x6a4   : > { %v1007_v52 = vmul.f32 0.6931472, %v1320_v51 }
 0x6a6   : > { %v1008_v53 = vsub.f32 %v1000_v46, %v1007_v52 }
 0x6a8   : > { %1009 = vst.msk [vmem:[#allocation4] sm:$0x3] %vm996_vm8, %v1008_v53 }
 0x6a9 PF: > { %p1611_p10 = scmp.eq.s32.totalorder %s1076_s18, 3  ;;  %s1398_s26 = smov [#allocation4]  }
 0x6aa   : > { %s1017_s13 = sshll.u32 %s1398_s26, 4  ;;  %s1018_s13 = int_to_ptr.vmem [resolvable:$true] %s1017_s13 }
 0x6ab   : > { %s1321_s14 = scalar_lea.vmem %s1018_s13, 32  ;;  %p1328_p0 = scmp.lt.s32.totalorder %s1018_s13, %s1018_s13 }
 0x6ac   : > { %p1322_p11 = scmp.ne.s32.totalorder %s1018_s13, %s1321_s14  ;;  %p1329_p1 = scmp.lt.s32.totalorder %s1321_s14, %s1321_s14 }
 0x6ae   : > { %p1323_p12 = pnand %p1322_p11, %p1611_p10  ;;  %p1330_p2 = por %p1329_p1, %p1328_p0 }
 0x6b0   : > { %p1324_p13 = pneg %p1323_p12 }
 0x6b2   : > { %p1331_p3 = pnand %p1330_p2, %p1324_p13 }
 0x6b4   : > { %1334 = shalt.err (!%p1331_p3)
}
 0x6b5   : > { %s1335_s18 = scalar_lea.hbm %s1662_s10, 32 }
 0x6b6   : > { %p1336_p4 = scmp.ne.s32.totalorder %s1662_s10, %s1335_s18  ;;  %p1341_p7 = scmp.lt.u32.totalorder %s1335_s18, %s1662_s10 }
 0x6b8   : > { %p1337_p5 = pnand %p1336_p4, %p1611_p10 }
 0x6ba   : > { %p1338_p6 = pneg %p1337_p5 }
 0x6bc   : > { %p1343_p8 = pnand %p1341_p7, %p1338_p6 }
 0x6be   : > { %1346 = shalt.err (!%p1343_p8)
}
 0x6bf   : > { %1260 = dma.vmem_to_hbm [thread:$0]  (%p1611_p10), %s1018_s13, 32, %s1662_s10, [#allocation5]  }
 0x6c0   : > { %1368 = dma.done.wait (%p1611_p10), [#allocation5], 32  }
 0x6c1   : > { %1370 = vsyncadd (%p1611_p10), [#allocation5], 4294967264 }
 0x6c2 PF: > { %s21_s17 = sadd.s32 1, %s1389_s17   ;;  %s1664_s13 = smov %s1381_s15 }
 0x6c3   : > { %p18_p9 = scmp.ge.s32.totalorder %s21_s17, 6   ;;  %s1665_s14 = smov %s1385_s16 }
 0x6c4   : > { %s1666_s15 = smov %s1669_s19  ;;  %s1667_s16 = smov %s1673_s20 }
 0x6c5   :  { %20 = sbr.rel (!%p18_p9) target bundleno = 3 (0x3), region = 107 }
 0x6cc   :  { %1030 = vsyncpa [#allocation5], 1 }
 0x6cd   :  { %1032 = vsyncpa [#allocation5 + $0x1], 1 }

</bundles_post_ra>
